<compile_context>
chip_gen: v7x
topology: tpu7x:2x2x1
jax: 0.10.0
libtpu: 0.0.40
codegen_flags: <defaults>
</compile_context>

<pallas_src>
import functools
import numpy as np
import jax
import jax.numpy as jnp
from jax import lax
from jax.experimental import pallas as pl
from jax.experimental.pallas import tpu as pltpu


# ----------------------------------------------------------------------------
# Fused Pallas kernel: one grid step = one batch element, lane-major layout
# ----------------------------------------------------------------------------
def _graph_kernel(f_ref, g_ref, mL_ref, qL_ref, csL_ref, valid_ref, dmask_ref,
                  out_u_ref, out_d_ref, *, N, E, V):
    f = f_ref[0]                                                # (HC, T*N) f32
    csL = csL_ref[...]                                          # (H, HC) f32 channel-sum

    # ------------------------------ undirected ------------------------------
    # M is linear: M(fi - fj) = M fi - (M f)_j ; apply M once to the slab.
    mf = jnp.dot(mL_ref[...], f, preferred_element_type=jnp.float32)   # (HC, T*N)
    mf_bf = mf.astype(jnp.bfloat16)                             # bf16 MXU gather operand
    w_list = []
    deg = None
    for e in range(E):
        # neighbor gather for ALL T timesteps at once: one-hot bf16 matmul
        mj = jnp.dot(mf_bf, g_ref[e], preferred_element_type=jnp.float32)   # (HC, T*N)
        d = mf - mj
        ss = jnp.dot(csL, d * d, preferred_element_type=jnp.float32)        # (H, T*N)
        w_e = jnp.exp(-ss) * valid_ref[e]                       # mask missing (-1) edges
        w_list.append(w_e)
        deg = w_e if deg is None else deg + w_e                 # degree accumulation
    deg_bf = deg.astype(jnp.bfloat16)
    # TODO(synk): for large E, stream w_e through a VMEM scratch slab instead
    # of keeping E live values across the normalization loop.
    u_rows = []
    for e in range(E):
        deg_j = jnp.dot(deg_bf, g_ref[e], preferred_element_type=jnp.float32)  # (H, T*N)
        dm = deg * deg_j
        norm = jnp.where(dm > 0, lax.rsqrt(dm), 0.0)
        u_rows.append(w_list[e] * norm)
    out_u_ref[0, :, :] = jnp.concatenate(u_rows, axis=0)        # single (E*H, T*N) store

    # ------------------------------- directed -------------------------------
    wv_list = []
    indeg = None
    for v in range(V):
        qf = jnp.dot(qL_ref[v], f, preferred_element_type=jnp.float32)      # (HC, T*N)
        # fi time index is (t - (v+1)) mod T: a lane rotation by (v+1)*N.
        qi = pltpu.roll(qf, shift=(v + 1) * N, axis=1)
        dd = qi - qf
        ev = jnp.exp(-(dd * dd))                                # per-channel exp (f32 EUP)
        wv = jnp.dot(csL, ev, preferred_element_type=jnp.float32)           # (H, T*N)
        wv = wv * dmask_ref[v]                                  # tril time mask (zeros t <= v)
        wv_list.append(wv)
        indeg = wv if indeg is None else indeg + wv
    # t == 0 lanes have indeg == 0 -> inv == 0 -> rows stay zero (sliced off
    # in the wrapper).  approx reciprocal (~2^-12 rel err) is a deliberate,
    # documented divergence from the exact 1/indeg of the reference.
    inv = jnp.where(indeg > 0, pl.reciprocal(indeg, approx=True), 0.0)
    out_d_ref[0, :, :] = jnp.concatenate([wv * inv for wv in wv_list], axis=0)


# ----------------------------------------------------------------------------
# Module wrapper (deterministic parameter init matching the PyTorch __init__
# with default flags)
# ----------------------------------------------------------------------------
class GraphLearningPallas:
    def __init__(self, T, n_nodes, nearest_nodes, n_heads, interval, n_channels,
                 Q1_init=1.2, M_init=1.5):
        self.T, self.N, self.H, self.C, self.V = T, n_nodes, n_heads, n_channels, interval
        nearest = np.asarray(nearest_nodes, dtype=np.int64)
        self.E = nearest.shape[1] - 1
        N, H, C, V, E = self.N, self.H, self.C, self.V, self.E
        HC, L = H * C, T * N

        # --- parameters (same deterministic init as torch with default flags) ---
        multiM = M_init * np.stack([np.eye(C, dtype=np.float32)] * H)                 # (H,C,C)
        scale = np.linspace(1.0, Q1_init, V, dtype=np.float32).reshape(V, 1, 1, 1)
        multiQ = np.stack([np.stack([np.eye(C, dtype=np.float32)] * H)] * V) * scale  # (V,H,C,C)
        self.multiM = jnp.asarray(multiM)
        self.multiQ = jnp.asarray(multiQ)

        # block-diagonal per-head matrices for LEFT-multiplying the lane-major
        # (HC, T*N) feature slab.  Kept f32: a negligible share of the MXU work.
        # TODO(synk): for large H, use per-head (C,C) multiplies instead of the
        # mostly-zero (HC,HC) block-diagonal.
        mL = np.zeros((HC, HC), np.float32)
        for h in range(H):
            mL[h * C:(h + 1) * C, h * C:(h + 1) * C] = multiM[h]
        qL = np.zeros((V, HC, HC), np.float32)
        for v in range(V):
            for h in range(H):
                qL[v, h * C:(h + 1) * C, h * C:(h + 1) * C] = multiQ[v, h]
        self.mL, self.qL = jnp.asarray(mL), jnp.asarray(qL)

        # per-head channel-sum (H, HC), f32 (multiplies f32 elementwise results)
        csL = np.zeros((H, HC), np.float32)
        for h in range(H):
            csL[h, h * C:(h + 1) * C] = 1.0
        self.csL = jnp.asarray(csL)

        # per-edge one-hot gather matrices, block-diagonal over TIME so one
        # matmul gathers all T steps; right-multiply convention.  bf16: the
        # dominant constant bytes and the dominant MXU operand.
        idx = nearest[:, 1:]                                   # (N, E)
        G = np.zeros((E, L, L), np.float32)
        valid = np.zeros((E, 1, L), np.float32)
        for n in range(N):
            for e in range(E):
                m = idx[n, e]
                if m >= 0:
                    for t in range(T):
                        G[e, t * N + m, t * N + n] = 1.0
                        valid[e, 0, t * N + n] = 1.0
        self.G = jnp.asarray(G, dtype=jnp.bfloat16)
        self.valid = jnp.asarray(valid)

        # directed lower-triangular time mask over lanes (t, n): keep t >= v+1
        dmask = np.zeros((V, 1, L), np.float32)
        for v in range(V):
            for t in range(T):
                if t >= v + 1:
                    dmask[v, 0, t * N:(t + 1) * N] = 1.0
        self.dmask = jnp.asarray(dmask)

    def __call__(self, features):
        B, T, N, H, C = features.shape
        E, V, HC, L = self.E, self.V, H * C, T * N

        # lane-major layout: lanes = (t, n), sublanes = (h, c)  (layout plumbing)
        f_lane = jnp.transpose(features.reshape(B, L, HC), (0, 2, 1))

        kernel = functools.partial(_graph_kernel, N=N, E=E, V=V)

        def _const_spec(arr):
            nd = arr.ndim
            # TODO(synk): on v7x, single-buffer these constant blocks
            # (pipeline_mode=pl.Buffered(1)) to halve their VMEM footprint.
            return pl.BlockSpec(arr.shape, lambda b, _nd=nd: (0,) * _nd)

        # TODO(synk): for large T*N*HC configs, T-tile the per-batch block
        # (with a V-row halo for the directed path) to stay inside v7x VMEM.
        out_u, out_d = pl.pallas_call(
            kernel,
            out_shape=(jax.ShapeDtypeStruct((B, E * H, L), jnp.float32),
                       jax.ShapeDtypeStruct((B, V * H, L), jnp.float32)),
            grid=(B,),
            in_specs=[
                pl.BlockSpec((1, HC, L), lambda b: (b, 0, 0)),
                _const_spec(self.G), _const_spec(self.mL), _const_spec(self.qL),
                _const_spec(self.csL), _const_spec(self.valid), _const_spec(self.dmask),
            ],
            out_specs=(pl.BlockSpec((1, E * H, L), lambda b: (b, 0, 0)),
                       pl.BlockSpec((1, V * H, L), lambda b: (b, 0, 0))),
            compiler_params=pltpu.CompilerParams(
                dimension_semantics=("parallel",),
                vmem_limit_bytes=32 * 1024 * 1024),
        )(f_lane, self.G, self.mL, self.qL, self.csL, self.valid, self.dmask)

        # layout plumbing back to the torch module's output shapes
        u = jnp.transpose(out_u.reshape(B, E, H, T, N), (0, 3, 4, 1, 2))        # (B,T,N,E,H)
        d = jnp.transpose(out_d.reshape(B, V, H, T, N), (0, 3, 1, 4, 2))[:, 1:]  # (B,T-1,V,N,H)
        return u, d


# ----------------------------------------------------------------------------
# Pure-JAX reference (mirrors the PyTorch forward with default flags)
# ----------------------------------------------------------------------------
def ref_forward(features, nearest, multiM, multiQ, interval):
    B, T, N, H, C = features.shape
    E = nearest.shape[1] - 1
    idx = nearest[:, 1:]
    padf = jnp.concatenate([features, jnp.zeros((B, T, 1, H, C), features.dtype)], axis=2)
    fj = padf[:, :, np.where(idx < 0, N, idx).reshape(-1)].reshape(B, T, N, E, H, C)
    df = features[:, :, :, None] - fj
    Mdf = jnp.einsum('hij,btnehj->btnehi', multiM, df)
    w = jnp.exp(-jnp.sum(Mdf ** 2, axis=-1))
    w = w * (idx != -1).astype(features.dtype)[None, None, :, :, None]
    degree = w.sum(3)
    dj = degree[:, :, np.where(idx < 0, N - 1, idx).reshape(-1)].reshape(B, T, N, E, H)
    dm = degree[:, :, :, None] * dj
    u = w * jnp.sqrt(jnp.where(dm > 0, 1.0 / dm, 0.0))

    V = interval
    wrap = ((np.arange(1, T)[:, None] - np.arange(1, V + 1)) % T).reshape(-1)
    fi_d = features[:, wrap].reshape(B, T - 1, V, N, H, C)
    dfd = fi_d - features[:, 1:][:, :, None]
    Qdf = jnp.einsum('vhij,btvnhj->btvnhi', multiQ, dfd)
    wd = jnp.sum(jnp.exp(-(Qdf ** 2)), axis=-1)
    mask = np.tril(np.ones((T - 1, V), dtype=np.float32))
    wd = wd * mask[None, :, :, None, None]
    indeg = wd.sum(2, keepdims=True)
    d = wd * jnp.where(indeg > 0, 1.0 / indeg, 0.0)
    return u, d


# ----------------------------------------------------------------------------
if __name__ == "__main__":
    B, T, N, H, C = 2, 8, 16, 2, 4
    interval, K = 3, 4

    # deterministic nearest-neighbor table (column 0 = self, -1 = missing edge)
    nearest = np.zeros((N, K), dtype=np.int64)
    for n in range(N):
        nearest[n, 0] = n
        nearest[n, 1] = (n + 1) % N
        nearest[n, 2] = (n - 1) % N
        nearest[n, 3] = (n + 2) % N if (n % 3 != 0) else -1

    key = jax.random.PRNGKey(0)
    features = 0.3 * jax.random.normal(key, (B, T, N, H, C), dtype=jnp.float32)

    mod = GraphLearningPallas(T, N, nearest, H, interval, C)
    u_ew, d_ew = mod(features)
    u_ew = jax.block_until_ready(u_ew)
    d_ew = jax.block_until_ready(d_ew)

    u_ref, d_ref = ref_forward(features, nearest, mod.multiM, mod.multiQ, interval)
    assert u_ew.shape == (B, T, N, K - 1, H) and d_ew.shape == (B, T - 1, interval, N, H)
    assert np.allclose(np.asarray(u_ew), np.asarray(u_ref), rtol=2e-2, atol=2e-2)
    assert np.allclose(np.asarray(d_ew), np.asarray(d_ref), rtol=2e-2, atol=2e-2)
    print("KERNEL_OK")
</pallas_src>

<mosaic_0001>
module attributes {stable_mosaic.version = 11 : i64} {
  func.func @_graph_kernel(%arg0: i32, %arg1: memref<1x8x128xf32, #tpu.memory_space<vmem>>, %arg2: memref<3x128x128xbf16, #tpu.memory_space<vmem>>, %arg3: memref<8x8xf32, #tpu.memory_space<vmem>>, %arg4: memref<3x8x8xf32, #tpu.memory_space<vmem>>, %arg5: memref<2x8xf32, #tpu.memory_space<vmem>>, %arg6: memref<3x1x128xf32, #tpu.memory_space<vmem>>, %arg7: memref<3x1x128xf32, #tpu.memory_space<vmem>>, %arg8: memref<1x6x128xf32, #tpu.memory_space<vmem>>, %arg9: memref<1x6x128xf32, #tpu.memory_space<vmem>>) attributes {dimension_semantics = [#tpu.dimension_semantics<parallel>], iteration_bounds = array<i64: 2>, scalar_prefetch = 0 : i64, scratch_operands = 0 : i64, tpu.core_type = #tpu.core_type<tc>, window_params = [{transform_indices = @transform_0, window_bounds = array<i64: 1, 8, 128>}, {pipeline_mode = #tpu.pipeline_mode<synchronous>, transform_indices = @transform_1, window_bounds = array<i64: 3, 128, 128>}, {pipeline_mode = #tpu.pipeline_mode<synchronous>, transform_indices = @transform_2, window_bounds = array<i64: 8, 8>}, {pipeline_mode = #tpu.pipeline_mode<synchronous>, transform_indices = @transform_3, window_bounds = array<i64: 3, 8, 8>}, {pipeline_mode = #tpu.pipeline_mode<synchronous>, transform_indices = @transform_4, window_bounds = array<i64: 2, 8>}, {pipeline_mode = #tpu.pipeline_mode<synchronous>, transform_indices = @transform_5, window_bounds = array<i64: 3, 1, 128>}, {pipeline_mode = #tpu.pipeline_mode<synchronous>, transform_indices = @transform_6, window_bounds = array<i64: 3, 1, 128>}, {transform_indices = @transform_7, window_bounds = array<i64: 1, 6, 128>}, {transform_indices = @transform_8, window_bounds = array<i64: 1, 6, 128>}]} {
    %c0 = arith.constant 0 : index
    %c0_0 = arith.constant 0 : index
    %c0_1 = arith.constant 0 : index
    %0 = vector.load %arg1[%c0, %c0_0, %c0_1] : memref<1x8x128xf32, #tpu.memory_space<vmem>>, vector<1x8x128xf32>
    %1 = vector.shape_cast %0 : vector<1x8x128xf32> to vector<8x128xf32>
    %c0_2 = arith.constant 0 : index
    %c0_3 = arith.constant 0 : index
    %2 = vector.load %arg5[%c0_2, %c0_3] : memref<2x8xf32, #tpu.memory_space<vmem>>, vector<2x8xf32>
    %c0_4 = arith.constant 0 : index
    %c0_5 = arith.constant 0 : index
    %3 = vector.load %arg3[%c0_4, %c0_5] : memref<8x8xf32, #tpu.memory_space<vmem>>, vector<8x8xf32>
    %cst = arith.constant dense<0.000000e+00> : vector<8x128xf32>
    %4 = tpu.matmul %3, %1, %cst {dimension_numbers = #tpu.dot_dimension_numbers<[1], [0], [0], [1], [0, 0, 1, 1], [], []>} : vector<8x8xf32>, vector<8x128xf32>, vector<8x128xf32> -> vector<8x128xf32>
    %5 = arith.truncf %4 : vector<8x128xf32> to vector<8x128xbf16>
    %c0_6 = arith.constant 0 : index
    %c0_7 = arith.constant 0 : index
    %c0_8 = arith.constant 0 : index
    %6 = vector.load %arg2[%c0_6, %c0_7, %c0_8] : memref<3x128x128xbf16, #tpu.memory_space<vmem>>, vector<1x128x128xbf16>
    %7 = vector.shape_cast %6 : vector<1x128x128xbf16> to vector<128x128xbf16>
    %cst_9 = arith.constant dense<0.000000e+00> : vector<8x128xf32>
    %8 = tpu.matmul %5, %7, %cst_9 {dimension_numbers = #tpu.dot_dimension_numbers<[1], [0], [0], [1], [0, 0, 1, 1], [], []>} : vector<8x128xbf16>, vector<128x128xbf16>, vector<8x128xf32> -> vector<8x128xf32>
    %9 = arith.subf %4, %8 : vector<8x128xf32>
    %10 = arith.mulf %9, %9 : vector<8x128xf32>
    %cst_10 = arith.constant dense<0.000000e+00> : vector<2x128xf32>
    %11 = tpu.matmul %2, %10, %cst_10 {dimension_numbers = #tpu.dot_dimension_numbers<[1], [0], [0], [1], [0, 0, 1, 1], [], []>} : vector<2x8xf32>, vector<8x128xf32>, vector<2x128xf32> -> vector<2x128xf32>
    %cst_11 = arith.constant 0.000000e+00 : f32
    %12 = vector.broadcast %cst_11 : f32 to vector<2x128xf32>
    %13 = arith.subf %12, %11 : vector<2x128xf32>
    %14 = math.exp %13 : vector<2x128xf32>
    %c0_12 = arith.constant 0 : index
    %c0_13 = arith.constant 0 : index
    %c0_14 = arith.constant 0 : index
    %15 = vector.load %arg6[%c0_12, %c0_13, %c0_14] : memref<3x1x128xf32, #tpu.memory_space<vmem>>, vector<1x1x128xf32>
    %16 = vector.shape_cast %15 : vector<1x1x128xf32> to vector<1x128xf32>
    %17 = vector.broadcast %16 : vector<1x128xf32> to vector<2x128xf32>
    %18 = arith.mulf %14, %17 : vector<2x128xf32>
    %c1 = arith.constant 1 : index
    %c0_15 = arith.constant 0 : index
    %c0_16 = arith.constant 0 : index
    %19 = vector.load %arg2[%c1, %c0_15, %c0_16] : memref<3x128x128xbf16, #tpu.memory_space<vmem>>, vector<1x128x128xbf16>
    %20 = vector.shape_cast %19 : vector<1x128x128xbf16> to vector<128x128xbf16>
    %cst_17 = arith.constant dense<0.000000e+00> : vector<8x128xf32>
    %21 = tpu.matmul %5, %20, %cst_17 {dimension_numbers = #tpu.dot_dimension_numbers<[1], [0], [0], [1], [0, 0, 1, 1], [], []>} : vector<8x128xbf16>, vector<128x128xbf16>, vector<8x128xf32> -> vector<8x128xf32>
    %22 = arith.subf %4, %21 : vector<8x128xf32>
    %23 = arith.mulf %22, %22 : vector<8x128xf32>
    %cst_18 = arith.constant dense<0.000000e+00> : vector<2x128xf32>
    %24 = tpu.matmul %2, %23, %cst_18 {dimension_numbers = #tpu.dot_dimension_numbers<[1], [0], [0], [1], [0, 0, 1, 1], [], []>} : vector<2x8xf32>, vector<8x128xf32>, vector<2x128xf32> -> vector<2x128xf32>
    %cst_19 = arith.constant 0.000000e+00 : f32
    %25 = vector.broadcast %cst_19 : f32 to vector<2x128xf32>
    %26 = arith.subf %25, %24 : vector<2x128xf32>
    %27 = math.exp %26 : vector<2x128xf32>
    %c1_20 = arith.constant 1 : index
    %c0_21 = arith.constant 0 : index
    %c0_22 = arith.constant 0 : index
    %28 = vector.load %arg6[%c1_20, %c0_21, %c0_22] : memref<3x1x128xf32, #tpu.memory_space<vmem>>, vector<1x1x128xf32>
    %29 = vector.shape_cast %28 : vector<1x1x128xf32> to vector<1x128xf32>
    %30 = vector.broadcast %29 : vector<1x128xf32> to vector<2x128xf32>
    %31 = arith.mulf %27, %30 : vector<2x128xf32>
    %32 = arith.addf %18, %31 : vector<2x128xf32>
    %c2 = arith.constant 2 : index
    %c0_23 = arith.constant 0 : index
    %c0_24 = arith.constant 0 : index
    %33 = vector.load %arg2[%c2, %c0_23, %c0_24] : memref<3x128x128xbf16, #tpu.memory_space<vmem>>, vector<1x128x128xbf16>
    %34 = vector.shape_cast %33 : vector<1x128x128xbf16> to vector<128x128xbf16>
    %cst_25 = arith.constant dense<0.000000e+00> : vector<8x128xf32>
    %35 = tpu.matmul %5, %34, %cst_25 {dimension_numbers = #tpu.dot_dimension_numbers<[1], [0], [0], [1], [0, 0, 1, 1], [], []>} : vector<8x128xbf16>, vector<128x128xbf16>, vector<8x128xf32> -> vector<8x128xf32>
    %36 = arith.subf %4, %35 : vector<8x128xf32>
    %37 = arith.mulf %36, %36 : vector<8x128xf32>
    %cst_26 = arith.constant dense<0.000000e+00> : vector<2x128xf32>
    %38 = tpu.matmul %2, %37, %cst_26 {dimension_numbers = #tpu.dot_dimension_numbers<[1], [0], [0], [1], [0, 0, 1, 1], [], []>} : vector<2x8xf32>, vector<8x128xf32>, vector<2x128xf32> -> vector<2x128xf32>
    %cst_27 = arith.constant 0.000000e+00 : f32
    %39 = vector.broadcast %cst_27 : f32 to vector<2x128xf32>
    %40 = arith.subf %39, %38 : vector<2x128xf32>
    %41 = math.exp %40 : vector<2x128xf32>
    %c2_28 = arith.constant 2 : index
    %c0_29 = arith.constant 0 : index
    %c0_30 = arith.constant 0 : index
    %42 = vector.load %arg6[%c2_28, %c0_29, %c0_30] : memref<3x1x128xf32, #tpu.memory_space<vmem>>, vector<1x1x128xf32>
    %43 = vector.shape_cast %42 : vector<1x1x128xf32> to vector<1x128xf32>
    %44 = vector.broadcast %43 : vector<1x128xf32> to vector<2x128xf32>
    %45 = arith.mulf %41, %44 : vector<2x128xf32>
    %46 = arith.addf %32, %45 : vector<2x128xf32>
    %47 = arith.truncf %46 : vector<2x128xf32> to vector<2x128xbf16>
    %c0_31 = arith.constant 0 : index
    %c0_32 = arith.constant 0 : index
    %c0_33 = arith.constant 0 : index
    %48 = vector.load %arg2[%c0_31, %c0_32, %c0_33] : memref<3x128x128xbf16, #tpu.memory_space<vmem>>, vector<1x128x128xbf16>
    %49 = vector.shape_cast %48 : vector<1x128x128xbf16> to vector<128x128xbf16>
    %cst_34 = arith.constant dense<0.000000e+00> : vector<2x128xf32>
    %50 = tpu.matmul %47, %49, %cst_34 {dimension_numbers = #tpu.dot_dimension_numbers<[1], [0], [0], [1], [0, 0, 1, 1], [], []>} : vector<2x128xbf16>, vector<128x128xbf16>, vector<2x128xf32> -> vector<2x128xf32>
    %51 = arith.mulf %46, %50 : vector<2x128xf32>
    %cst_35 = arith.constant 0.000000e+00 : f32
    %52 = vector.broadcast %cst_35 : f32 to vector<2x128xf32>
    %53 = arith.cmpf ogt, %51, %52 : vector<2x128xf32>
    %54 = math.rsqrt %51 : vector<2x128xf32>
    %cst_36 = arith.constant 0.000000e+00 : f32
    %55 = vector.broadcast %cst_36 : f32 to vector<2x128xf32>
    %56 = arith.select %53, %54, %55 : vector<2x128xi1>, vector<2x128xf32>
    %57 = arith.mulf %18, %56 : vector<2x128xf32>
    %c1_37 = arith.constant 1 : index
    %c0_38 = arith.constant 0 : index
    %c0_39 = arith.constant 0 : index
    %58 = vector.load %arg2[%c1_37, %c0_38, %c0_39] : memref<3x128x128xbf16, #tpu.memory_space<vmem>>, vector<1x128x128xbf16>
    %59 = vector.shape_cast %58 : vector<1x128x128xbf16> to vector<128x128xbf16>
    %cst_40 = arith.constant dense<0.000000e+00> : vector<2x128xf32>
    %60 = tpu.matmul %47, %59, %cst_40 {dimension_numbers = #tpu.dot_dimension_numbers<[1], [0], [0], [1], [0, 0, 1, 1], [], []>} : vector<2x128xbf16>, vector<128x128xbf16>, vector<2x128xf32> -> vector<2x128xf32>
    %61 = arith.mulf %46, %60 : vector<2x128xf32>
    %cst_41 = arith.constant 0.000000e+00 : f32
    %62 = vector.broadcast %cst_41 : f32 to vector<2x128xf32>
    %63 = arith.cmpf ogt, %61, %62 : vector<2x128xf32>
    %64 = math.rsqrt %61 : vector<2x128xf32>
    %cst_42 = arith.constant 0.000000e+00 : f32
    %65 = vector.broadcast %cst_42 : f32 to vector<2x128xf32>
    %66 = arith.select %63, %64, %65 : vector<2x128xi1>, vector<2x128xf32>
    %67 = arith.mulf %31, %66 : vector<2x128xf32>
    %c2_43 = arith.constant 2 : index
    %c0_44 = arith.constant 0 : index
    %c0_45 = arith.constant 0 : index
    %68 = vector.load %arg2[%c2_43, %c0_44, %c0_45] : memref<3x128x128xbf16, #tpu.memory_space<vmem>>, vector<1x128x128xbf16>
    %69 = vector.shape_cast %68 : vector<1x128x128xbf16> to vector<128x128xbf16>
    %cst_46 = arith.constant dense<0.000000e+00> : vector<2x128xf32>
    %70 = tpu.matmul %47, %69, %cst_46 {dimension_numbers = #tpu.dot_dimension_numbers<[1], [0], [0], [1], [0, 0, 1, 1], [], []>} : vector<2x128xbf16>, vector<128x128xbf16>, vector<2x128xf32> -> vector<2x128xf32>
    %71 = arith.mulf %46, %70 : vector<2x128xf32>
    %cst_47 = arith.constant 0.000000e+00 : f32
    %72 = vector.broadcast %cst_47 : f32 to vector<2x128xf32>
    %73 = arith.cmpf ogt, %71, %72 : vector<2x128xf32>
    %74 = math.rsqrt %71 : vector<2x128xf32>
    %cst_48 = arith.constant 0.000000e+00 : f32
    %75 = vector.broadcast %cst_48 : f32 to vector<2x128xf32>
    %76 = arith.select %73, %74, %75 : vector<2x128xi1>, vector<2x128xf32>
    %77 = arith.mulf %45, %76 : vector<2x128xf32>
    %78 = tpu.concatenate %57, %67, %77 in 0 : vector<2x128xf32>, vector<2x128xf32>, vector<2x128xf32> -> vector<6x128xf32>
    %c0_49 = arith.constant 0 : index
    %c0_50 = arith.constant 0 : index
    %c0_51 = arith.constant 0 : index
    %79 = vector.load %arg8[%c0_49, %c0_50, %c0_51] : memref<1x6x128xf32, #tpu.memory_space<vmem>>, vector<1x6x128xf32>
    %80 = vector.shape_cast %79 : vector<1x6x128xf32> to vector<6x128xf32>
    %81 = vector.shape_cast %78 : vector<6x128xf32> to vector<1x6x128xf32>
    tpu.vector_store %arg8[%c0_49, %c0_50, %c0_51], %81 {strides = array<i32>} : memref<1x6x128xf32, #tpu.memory_space<vmem>>, vector<1x6x128xf32>,
    %c0_52 = arith.constant 0 : index
    %c0_53 = arith.constant 0 : index
    %c0_54 = arith.constant 0 : index
    %82 = vector.load %arg4[%c0_52, %c0_53, %c0_54] : memref<3x8x8xf32, #tpu.memory_space<vmem>>, vector<1x8x8xf32>
    %83 = vector.shape_cast %82 : vector<1x8x8xf32> to vector<8x8xf32>
    %cst_55 = arith.constant dense<0.000000e+00> : vector<8x128xf32>
    %84 = tpu.matmul %83, %1, %cst_55 {dimension_numbers = #tpu.dot_dimension_numbers<[1], [0], [0], [1], [0, 0, 1, 1], [], []>} : vector<8x8xf32>, vector<8x128xf32>, vector<8x128xf32> -> vector<8x128xf32>
    %c16_i32 = arith.constant 16 : i32
    %85 = tpu.dynamic_rotate %84 by %c16_i32 dim 1 : vector<8x128xf32>, i32 -> vector<8x128xf32>
    %86 = arith.subf %85, %84 : vector<8x128xf32>
    %87 = arith.mulf %86, %86 : vector<8x128xf32>
    %cst_56 = arith.constant 0.000000e+00 : f32
    %88 = vector.broadcast %cst_56 : f32 to vector<8x128xf32>
    %89 = arith.subf %88, %87 : vector<8x128xf32>
    %90 = math.exp %89 : vector<8x128xf32>
    %cst_57 = arith.constant dense<0.000000e+00> : vector<2x128xf32>
    %91 = tpu.matmul %2, %90, %cst_57 {dimension_numbers = #tpu.dot_dimension_numbers<[1], [0], [0], [1], [0, 0, 1, 1], [], []>} : vector<2x8xf32>, vector<8x128xf32>, vector<2x128xf32> -> vector<2x128xf32>
    %c0_58 = arith.constant 0 : index
    %c0_59 = arith.constant 0 : index
    %c0_60 = arith.constant 0 : index
    %92 = vector.load %arg7[%c0_58, %c0_59, %c0_60] : memref<3x1x128xf32, #tpu.memory_space<vmem>>, vector<1x1x128xf32>
    %93 = vector.shape_cast %92 : vector<1x1x128xf32> to vector<1x128xf32>
    %94 = vector.broadcast %93 : vector<1x128xf32> to vector<2x128xf32>
    %95 = arith.mulf %91, %94 : vector<2x128xf32>
    %c1_61 = arith.constant 1 : index
    %c0_62 = arith.constant 0 : index
    %c0_63 = arith.constant 0 : index
    %96 = vector.load %arg4[%c1_61, %c0_62, %c0_63] : memref<3x8x8xf32, #tpu.memory_space<vmem>>, vector<1x8x8xf32>
    %97 = vector.shape_cast %96 : vector<1x8x8xf32> to vector<8x8xf32>
    %cst_64 = arith.constant dense<0.000000e+00> : vector<8x128xf32>
    %98 = tpu.matmul %97, %1, %cst_64 {dimension_numbers = #tpu.dot_dimension_numbers<[1], [0], [0], [1], [0, 0, 1, 1], [], []>} : vector<8x8xf32>, vector<8x128xf32>, vector<8x128xf32> -> vector<8x128xf32>
    %c32_i32 = arith.constant 32 : i32
    %99 = tpu.dynamic_rotate %98 by %c32_i32 dim 1 : vector<8x128xf32>, i32 -> vector<8x128xf32>
    %100 = arith.subf %99, %98 : vector<8x128xf32>
    %101 = arith.mulf %100, %100 : vector<8x128xf32>
    %cst_65 = arith.constant 0.000000e+00 : f32
    %102 = vector.broadcast %cst_65 : f32 to vector<8x128xf32>
    %103 = arith.subf %102, %101 : vector<8x128xf32>
    %104 = math.exp %103 : vector<8x128xf32>
    %cst_66 = arith.constant dense<0.000000e+00> : vector<2x128xf32>
    %105 = tpu.matmul %2, %104, %cst_66 {dimension_numbers = #tpu.dot_dimension_numbers<[1], [0], [0], [1], [0, 0, 1, 1], [], []>} : vector<2x8xf32>, vector<8x128xf32>, vector<2x128xf32> -> vector<2x128xf32>
    %c1_67 = arith.constant 1 : index
    %c0_68 = arith.constant 0 : index
    %c0_69 = arith.constant 0 : index
    %106 = vector.load %arg7[%c1_67, %c0_68, %c0_69] : memref<3x1x128xf32, #tpu.memory_space<vmem>>, vector<1x1x128xf32>
    %107 = vector.shape_cast %106 : vector<1x1x128xf32> to vector<1x128xf32>
    %108 = vector.broadcast %107 : vector<1x128xf32> to vector<2x128xf32>
    %109 = arith.mulf %105, %108 : vector<2x128xf32>
    %110 = arith.addf %95, %109 : vector<2x128xf32>
    %c2_70 = arith.constant 2 : index
    %c0_71 = arith.constant 0 : index
    %c0_72 = arith.constant 0 : index
    %111 = vector.load %arg4[%c2_70, %c0_71, %c0_72] : memref<3x8x8xf32, #tpu.memory_space<vmem>>, vector<1x8x8xf32>
    %112 = vector.shape_cast %111 : vector<1x8x8xf32> to vector<8x8xf32>
    %cst_73 = arith.constant dense<0.000000e+00> : vector<8x128xf32>
    %113 = tpu.matmul %112, %1, %cst_73 {dimension_numbers = #tpu.dot_dimension_numbers<[1], [0], [0], [1], [0, 0, 1, 1], [], []>} : vector<8x8xf32>, vector<8x128xf32>, vector<8x128xf32> -> vector<8x128xf32>
    %c48_i32 = arith.constant 48 : i32
    %114 = tpu.dynamic_rotate %113 by %c48_i32 dim 1 : vector<8x128xf32>, i32 -> vector<8x128xf32>
    %115 = arith.subf %114, %113 : vector<8x128xf32>
    %116 = arith.mulf %115, %115 : vector<8x128xf32>
    %cst_74 = arith.constant 0.000000e+00 : f32
    %117 = vector.broadcast %cst_74 : f32 to vector<8x128xf32>
    %118 = arith.subf %117, %116 : vector<8x128xf32>
    %119 = math.exp %118 : vector<8x128xf32>
    %cst_75 = arith.constant dense<0.000000e+00> : vector<2x128xf32>
    %120 = tpu.matmul %2, %119, %cst_75 {dimension_numbers = #tpu.dot_dimension_numbers<[1], [0], [0], [1], [0, 0, 1, 1], [], []>} : vector<2x8xf32>, vector<8x128xf32>, vector<2x128xf32> -> vector<2x128xf32>
    %c2_76 = arith.constant 2 : index
    %c0_77 = arith.constant 0 : index
    %c0_78 = arith.constant 0 : index
    %121 = vector.load %arg7[%c2_76, %c0_77, %c0_78] : memref<3x1x128xf32, #tpu.memory_space<vmem>>, vector<1x1x128xf32>
    %122 = vector.shape_cast %121 : vector<1x1x128xf32> to vector<1x128xf32>
    %123 = vector.broadcast %122 : vector<1x128xf32> to vector<2x128xf32>
    %124 = arith.mulf %120, %123 : vector<2x128xf32>
    %125 = arith.addf %110, %124 : vector<2x128xf32>
    %cst_79 = arith.constant 0.000000e+00 : f32
    %126 = vector.broadcast %cst_79 : f32 to vector<2x128xf32>
    %127 = arith.cmpf ogt, %125, %126 : vector<2x128xf32>
    %128 = tpu.reciprocal %125 {approx = true} : vector<2x128xf32> -> vector<2x128xf32>
    %cst_80 = arith.constant 0.000000e+00 : f32
    %129 = vector.broadcast %cst_80 : f32 to vector<2x128xf32>
    %130 = arith.select %127, %128, %129 : vector<2x128xi1>, vector<2x128xf32>
    %131 = arith.mulf %95, %130 : vector<2x128xf32>
    %132 = arith.mulf %109, %130 : vector<2x128xf32>
    %133 = arith.mulf %124, %130 : vector<2x128xf32>
    %134 = tpu.concatenate %131, %132, %133 in 0 : vector<2x128xf32>, vector<2x128xf32>, vector<2x128xf32> -> vector<6x128xf32>
    %c0_81 = arith.constant 0 : index
    %c0_82 = arith.constant 0 : index
    %c0_83 = arith.constant 0 : index
    %135 = vector.load %arg9[%c0_81, %c0_82, %c0_83] : memref<1x6x128xf32, #tpu.memory_space<vmem>>, vector<1x6x128xf32>
    %136 = vector.shape_cast %135 : vector<1x6x128xf32> to vector<6x128xf32>
    %137 = vector.shape_cast %134 : vector<6x128xf32> to vector<1x6x128xf32>
    tpu.vector_store %arg9[%c0_81, %c0_82, %c0_83], %137 {strides = array<i32>} : memref<1x6x128xf32, #tpu.memory_space<vmem>>, vector<1x6x128xf32>,
    return
  }
  func.func @transform_0(%arg0: i32) -> (i32, i32, i32) {
    %c0_i32 = arith.constant 0 : i32
    %c0_i32_0 = arith.constant 0 : i32
    %c0_i32_1 = arith.constant 0 : i32
    return %arg0, %c0_i32, %c0_i32_0 : i32, i32, i32
  }
  func.func @transform_1(%arg0: i32) -> (i32, i32, i32) {
    %c0_i32 = arith.constant 0 : i32
    %c0_i32_0 = arith.constant 0 : i32
    %c0_i32_1 = arith.constant 0 : i32
    %c0_i32_2 = arith.constant 0 : i32
    return %c0_i32, %c0_i32_0, %c0_i32_1 : i32, i32, i32
  }
  func.func @transform_2(%arg0: i32) -> (i32, i32) {
    %c0_i32 = arith.constant 0 : i32
    %c0_i32_0 = arith.constant 0 : i32
    %c0_i32_1 = arith.constant 0 : i32
    return %c0_i32, %c0_i32_0 : i32, i32
  }
  func.func @transform_3(%arg0: i32) -> (i32, i32, i32) {
    %c0_i32 = arith.constant 0 : i32
    %c0_i32_0 = arith.constant 0 : i32
    %c0_i32_1 = arith.constant 0 : i32
    %c0_i32_2 = arith.constant 0 : i32
    return %c0_i32, %c0_i32_0, %c0_i32_1 : i32, i32, i32
  }
  func.func @transform_4(%arg0: i32) -> (i32, i32) {
    %c0_i32 = arith.constant 0 : i32
    %c0_i32_0 = arith.constant 0 : i32
    %c0_i32_1 = arith.constant 0 : i32
    return %c0_i32, %c0_i32_0 : i32, i32
  }
  func.func @transform_5(%arg0: i32) -> (i32, i32, i32) {
    %c0_i32 = arith.constant 0 : i32
    %c0_i32_0 = arith.constant 0 : i32
    %c0_i32_1 = arith.constant 0 : i32
    %c0_i32_2 = arith.constant 0 : i32
    return %c0_i32, %c0_i32_0, %c0_i32_1 : i32, i32, i32
  }
  func.func @transform_6(%arg0: i32) -> (i32, i32, i32) {
    %c0_i32 = arith.constant 0 : i32
    %c0_i32_0 = arith.constant 0 : i32
    %c0_i32_1 = arith.constant 0 : i32
    %c0_i32_2 = arith.constant 0 : i32
    return %c0_i32, %c0_i32_0, %c0_i32_1 : i32, i32, i32
  }
  func.func @transform_7(%arg0: i32) -> (i32, i32, i32) {
    %c0_i32 = arith.constant 0 : i32
    %c0_i32_0 = arith.constant 0 : i32
    %c0_i32_1 = arith.constant 0 : i32
    return %arg0, %c0_i32, %c0_i32_0 : i32, i32, i32
  }
  func.func @transform_8(%arg0: i32) -> (i32, i32, i32) {
    %c0_i32 = arith.constant 0 : i32
    %c0_i32_0 = arith.constant 0 : i32
    %c0_i32_1 = arith.constant 0 : i32
    return %arg0, %c0_i32, %c0_i32_0 : i32, i32, i32
  }
}

</mosaic_0001>

<bundles_post_ra>
// kernel: tpu_custom_call.1
= control target key start
LH: loop header
LB: loop body
LE: loop exit
PB: predicated region body
PF: predicated region fallthrough
CT: control target
= control target key end

     0   :  { %14 = vsyncpa [#allocation3], 0  ;;  %s2885_s0 = inlined_call_operand.hbm [shape: f32[2,8,128], index: 0, kind: input, shape index: {}]   ;;  %s2886_s1 = inlined_call_operand.hbm [shape: bf16[3,128,128], index: 1, kind: input, shape index: {}]   ;;  %s2887_s2 = inlined_call_operand.hbm [shape: f32[8,8], index: 2, kind: input, shape index: {}]   ;;  %s2888_s3 = inlined_call_operand.hbm [shape: f32[3,8,8], index: 3, kind: input, shape index: {}]   ;;  %s2889_s4 = inlined_call_operand.vmem [shape: f32[2,8], index: 4, kind: input, shape index: {}]   ;;  %s2890_s5 = inlined_call_operand.vmem [shape: f32[3,1,128], index: 5, kind: input, shape index: {}]   ;;  %s2891_s6 = inlined_call_operand.vmem [shape: f32[3,1,128], index: 6, kind: input, shape index: {}]   ;;  %s2892_s7 = inlined_call_operand.vmem [shape: f32[2,6,128], index: 7, kind: output, shape index: {0}]   ;;  %s2893_s8 = inlined_call_operand.vmem [shape: f32[2,6,128], index: 8, kind: output, shape index: {1}]  }
   0x1   :  { %16 = vsyncpa [#allocation3 + $0x1], 0 }
   0x2   :  { %17 = vsyncpa [#allocation5], 0 }
   0x3   :  { %18 = vsyncpa [#allocation8], 0  ;;  %s2437_s27 = smov 0   ;;  %s2439_s28 = smov 0  }
   0x4   :  { %s2441_s29 = smov 0   ;;  %s2443_s30 = smov 0  }
   0x5 LB: > { %s2456_s9 = sadd.s32 4294967295, %s2377_s30   ;;  %p44_p0 = scmp.ne.s32.totalorder %s2369_s28, %s2365_s27  ;;  %s2377_s30 = sphi %s2443_s30, %s2911_s30   ;;  %s2373_s29 = sphi %s2441_s29, %s2910_s29   ;;  %s2369_s28 = sphi %s2439_s28, %s2909_s28   ;;  %s2365_s27 = sphi %s2437_s27, %s2908_s27  }
   0x6   : > { %p2894_p1 = scmp.eq.s32.totalorder %s2456_s9, 0  ;;  %p1794_p2 = scmp.ge.s32.totalorder %s2377_s30, 1 }
   0x7   : > { %p233_p3 = scmp.lt.s32.totalorder %s2377_s30, 3  ;;  %s2379_s12 = smov [#allocation4]  }
   0x8   : > { %p2464_p4 = por %p2894_p1, %p44_p0  ;;  %s245_s13 = sshll.u32 %s2379_s12, 4  ;;  %s2472_s13 = int_to_ptr.vmem [resolvable:$true] %s245_s13 }
   0x9   : > { %p2468_p5 = pnand %p1794_p2, %p233_p3  ;;  %s2380_s15 = smov [#allocation6]  }
   0xa   : > { %s2897_s10 = scalar_select %p2464_p4, 1, 0 }
   0xb   : > { %s2898_s11 = scalar_select %p2468_p5, 1, 0 }
   0xc   : > { %p2112_p6 = pneg %p2468_p5  ;;  %s259_s16 = sshll.u32 %s2380_s15, 4  ;;  %s2482_s16 = int_to_ptr.vmem [resolvable:$true] %s259_s16 }
   0xd   : > { %s2381_s17 = smov [#allocation7]   ;;  %s2221_s21 = scalar_lea.hbm %s2886_s1, 3072 }
   0xe   : > { %p2478_p7 = pnand %p2112_p6, %p2894_p1  ;;  %s2484_s18 = sshll.u32 %s2381_s17, 4  ;;  %s270_s18 = int_to_ptr.vmem [resolvable:$true] %s2484_s18 }
   0xf   : > { %p2222_p8 = scmp.ne.s32.totalorder %s2886_s1, %s2221_s21  ;;  %p2228_p12 = scmp.lt.u32.totalorder %s2221_s21, %s2886_s1 }
  0x10   : > { %p2494_p9 = pneg %p2478_p7 }
  0x12   : > { %p2224_p10 = pnand %p2494_p9, %p2222_p8 }
  0x14   : > { %p2225_p11 = pneg %p2224_p10 }
  0x16   : > { %p2230_p13 = pnand %p2228_p12, %p2225_p11 }
  0x18   : > { %2233 = shalt.err (!%p2230_p13)
}
  0x19   : > { %s2234_s27 = scalar_lea.vmem %s2472_s13, 3072  ;;  %p2242_p6 = scmp.lt.s32.totalorder %s2472_s13, %s2472_s13 }
  0x1a   : > { %p2235_p0 = scmp.ne.s32.totalorder %s2472_s13, %s2234_s27  ;;  %p2243_p1 = scmp.lt.s32.totalorder %s2234_s27, %s2234_s27 }
  0x1c   : > { %p2237_p2 = pnand %p2235_p0, %p2494_p9  ;;  %p2244_p8 = por %p2243_p1, %p2242_p6 }
  0x1e   : > { %p2238_p3 = pneg %p2237_p2 }
  0x20   : > { %p2245_p10 = pnand %p2244_p8, %p2238_p3 }
  0x22   : > { %2248 = shalt.err (!%p2245_p10)
}
  0x23   : > { %s2382_s12 = smov 64   ;;  %s2383_s15 = smov 4  }
  0x24   : > { %2115 = dma.hbm_to_vmem [thread:$0]  (!%p2478_p7), %s2886_s1, 3072, %s2472_s13, [#allocation5], %s2382_s12, %s2382_s12, %s2383_s15  }
  0x25   : > { %s2249_s22 = scalar_lea.hbm %s2887_s2, 128 }
  0x26   : > { %p2250_p1 = scmp.ne.s32.totalorder %s2887_s2, %s2249_s22  ;;  %p2256_p13 = scmp.lt.u32.totalorder %s2249_s22, %s2887_s2 }
  0x28   : > { %p2252_p11 = pnand %p2250_p1, %p2494_p9 }
  0x2a   : > { %p2253_p12 = pneg %p2252_p11 }
  0x2c   : > { %p2258_p0 = pnand %p2256_p13, %p2253_p12 }
  0x2e   : > { %2261 = shalt.err (!%p2258_p0)
}
  0x2f   : > { %s2262_s13 = scalar_lea.vmem %s2482_s16, 128  ;;  %p2270_p8 = scmp.lt.s32.totalorder %s2482_s16, %s2482_s16 }
  0x30   : > { %p2263_p2 = scmp.ne.s32.totalorder %s2482_s16, %s2262_s13  ;;  %p2271_p10 = scmp.lt.s32.totalorder %s2262_s13, %s2262_s13 }
  0x32   : > { %p2265_p3 = pnand %p2263_p2, %p2494_p9  ;;  %p2272_p1 = por %p2271_p10, %p2270_p8 }
  0x34   : > { %p2266_p6 = pneg %p2265_p3 }
  0x36   : > { %p2273_p11 = pnand %p2272_p1, %p2266_p6 }
  0x38   : > { %2276 = shalt.err (!%p2273_p11)
}
  0x39   : > { %2118 = dma.hbm_to_vmem [thread:$0]  (!%p2478_p7), %s2887_s2, 128, %s2482_s16, [#allocation5]  }
  0x3a   : > { %s2277_s20 = scalar_lea.hbm %s2888_s3, 384 }
  0x3b   : > { %p2278_p12 = scmp.ne.s32.totalorder %s2888_s3, %s2277_s20  ;;  %p2284_p2 = scmp.lt.u32.totalorder %s2277_s20, %s2888_s3 }
  0x3d   : > { %p2280_p13 = pnand %p2278_p12, %p2494_p9 }
  0x3f   : > { %p2281_p0 = pneg %p2280_p13 }
  0x41   : > { %p2286_p3 = pnand %p2284_p2, %p2281_p0 }
  0x43   : > { %2289 = shalt.err (!%p2286_p3)
}
  0x44   : > { %s2290_s26 = scalar_lea.vmem %s270_s18, 384  ;;  %p2298_p1 = scmp.lt.s32.totalorder %s270_s18, %s270_s18 }
  0x45   : > { %p2291_p6 = scmp.ne.s32.totalorder %s270_s18, %s2290_s26  ;;  %p2299_p11 = scmp.lt.s32.totalorder %s2290_s26, %s2290_s26 }
  0x47   : > { %p2293_p8 = pnand %p2291_p6, %p2494_p9  ;;  %p2300_p4 = por %p2299_p11, %p2298_p1 }
  0x49   : > { %p2294_p10 = pneg %p2293_p8 }
  0x4b   : > { %p2301_p5 = pnand %p2300_p4, %p2294_p10 }
  0x4d   : > { %2304 = shalt.err (!%p2301_p5)
}
  0x4e   : > { %s2384_s16 = smov 128   ;;  %s2385_s24 = smov 8  }
  0x4f   : > { %2121 = dma.hbm_to_vmem [thread:$0]  (!%p2478_p7), %s2888_s3, 384, %s270_s18, [#allocation8], %s2384_s16, %s2384_s16, %s2385_s24  }
  0x50   : > { %s2558_s12 = sadd.s32 1, %s2377_s30   ;;  %s31_s17 = sadd.s32 1, %s2373_s29 }
  0x51   : > { %s28_s15 = ssub.s32 %s2377_s30, %s2558_s12  ;;  %p38_p5 = scmp.ne.s32.totalorder %s2373_s29, %s2369_s28 }
  0x52   : > { %p29_p4 = scmp.eq.s32.totalorder %s28_s15, 0  ;;  %p39_p9 = scmp.eq.s32.totalorder %s2377_s30, 0 }
  0x53   : > { %p2129_p12 = scmp.lt.s32.totalorder %s2377_s30, 2  ;;  %s292_s20 = sand.u32 1, %s2373_s29  }
  0x54   : > { %s2568_s19 = scalar_select %p29_p4, %s2373_s29, %s31_s17  }
  0x55   : > { %p40_p13 = por %p39_p9, %p38_p5  ;;  %s1799_s21 = sshll.u32 %s292_s20, 3 }
  0x56   : > { %s1800_s22 = sshll.u32 %s2377_s30, 7  ;;  %s296_s18 = scalar_lea.vmem [#allocation2], %s1799_s21 }
  0x57   : > { %s2575_s25 = scalar_lea.hbm %s2885_s0, %s1800_s22  ;;  %s303_s26 = sshll.u32 %s296_s18, 4  ;;  %s2577_s26 = int_to_ptr.vmem [resolvable:$true] %s303_s26 }
  0x58   : > { %p2579_p7 = pnand %p2129_p12, %p40_p13  ;;  %s293_s30 = scalar_lea.sflag [#allocation3], %s292_s20 }
  0x59   : > { %s2305_s24 = scalar_lea.hbm %s2575_s25, 128  ;;  %s2310_s15 = scalar_lea.hbm %s2885_s0, 256 }
  0x5a   : > { %p2306_p0 = scmp.ne.s32.totalorder %s2575_s25, %s2305_s24  ;;  %p2307_p2 = pneg %p2579_p7 }
  0x5b   : > { %p2311_p8 = scmp.lt.u32.totalorder %s2575_s25, %s2885_s0  ;;  %p2312_p10 = scmp.lt.u32.totalorder %s2310_s15, %s2305_s24 }
  0x5c   : > { %p2308_p3 = pnand %p2307_p2, %p2306_p0  ;;  %p2314_p11 = scmp.lt.u32.totalorder %s2305_s24, %s2575_s25 }
  0x5d   : > { %p2313_p1 = por %p2312_p10, %p2311_p8 }
  0x5e   : > { %p2309_p6 = pneg %p2308_p3 }
  0x5f   : > { %p2315_p4 = por %p2314_p11, %p2313_p1 }
  0x61   : > { %p2316_p5 = pnand %p2315_p4, %p2309_p6 }
  0x63   : > { %2319 = shalt.err (!%p2316_p5)
}
  0x64   : > { %s2320_s20 = scalar_lea.vmem %s2577_s26, 128  ;;  %s2386_s22 = smov [#allocation2]  }
  0x65   : > { %p2321_p9 = scmp.ne.s32.totalorder %s2577_s26, %s2320_s20  ;;  %s2325_s14 = sshll.u32 %s2386_s22, 4  ;;  %s2326_s14 = int_to_ptr.vmem [resolvable:$false] %s2325_s14 }
  0x66   : > { %s2327_s23 = scalar_lea.vmem %s2326_s14, 256  ;;  %p2328_p0 = scmp.lt.s32.totalorder %s2577_s26, %s2326_s14 }
  0x67   : > { %p2323_p12 = pnand %p2321_p9, %p2307_p2  ;;  %p2329_p3 = scmp.lt.s32.totalorder %s2327_s23, %s2320_s20 }
  0x69   : > { %p2324_p13 = pneg %p2323_p12  ;;  %p2330_p8 = por %p2329_p3, %p2328_p0 }
  0x6b   : > { %p2331_p10 = pnand %p2330_p8, %p2324_p13 }
  0x6d   : > { %2334 = shalt.err (!%p2331_p10)
}
  0x6e   : > { %2125 = dma.hbm_to_vmem [thread:$0]  (!%p2579_p7), %s2575_s25, 128, %s2577_s26, %s293_s30  }
  0x6f   : > { %p2902_p6 = scmp.ne.s32.totalorder %s2898_s11, 0 }
  0x70   : > { %s314_s18 = sand.u32 (!%p2902_p6), 1, %s2369_s28   ;;  %p2903_p2 = scmp.ne.s32.totalorder (!%p2902_p6), %s2897_s10, 0 }
  0x71   : > { %312 = sbr.rel (%p2902_p6) target bundleno = 1702 (0x6a6), region = 48  ;;  %s1802_s24 = sshll.u32 (!%p2902_p6), %s314_s18, 3 }
  0x72   : > { %s315_s27 = scalar_lea.sflag (!%p2902_p6), [#allocation3], %s314_s18  ;;  %s318_s13 = scalar_lea.vmem (!%p2902_p6), [#allocation2], %s1802_s24 }
  0x78   : > { %2352 = dma.done.wait (%p2903_p2), %s315_s27, 128  }
  0x79   : > { %2354 = vsyncadd (%p2903_p2), %s315_s27, 4294967168  ;;  %p2904_p1 = scmp.eq.s32.totalorder %s2456_s9, 0 }
  0x7b   : > { %2356 = dma.done.wait (%p2904_p1), [#allocation5], 3200   ;;  %p2905_p11 = pmov %p2904_p1 }
  0x7c   : > { %p2906_p7 = pmov %p2904_p1 }
  0x7d   : > { %2358 = vsyncadd (%p2905_p11), [#allocation5], 4294964096 }
  0x7e   : > { %2360 = dma.done.wait (%p2906_p7), [#allocation8], 384   ;;  %p2907_p4 = pmov %p2904_p1 }
  0x7f   : > { %v2387_v0 = vmov 0.0   ;;  %vm2388_vm0 = vmmov 0   ;;  %vm378_vm1 = vcmask 64512   ;;  %v2629_v1 = vld [vmem:[%s318_s13] sm:$0xff]  ;;  %v377_v2 = vld [vmem:[#allocation6] sm:$0xff]  ;;  %v2637_v4 = vld [vmem:[#allocation4 + $0x8] sm:$0xff]  }
  0x80   : > { %2362 = vsyncadd (%p2907_p4), [#allocation8], 4294966912  ;;  %1928 = vmatprep.subr.mxu0 %v2387_v0  ;;  %1930 = vmatprep.mubr.msk.f32.mxu0 %vm2388_vm0, %v2387_v0  ;;  %v2632_v3 = vld [vmem:[#allocation4] sm:$0xff]   ;;  %v2643_v5 = vld [vmem:[#allocation4 + $0x10] sm:$0xff]   ;;  %s2389_s21 = smov 16   ;;  %vm1165_vm4 = vcmask 1041408  }
  0x81   : > { %1933 = vmatprep.subr.bf16.mxu1 %v2387_v0  ;;  %1949 = vmatprep.mubr.msk.bf16.mxu1 %vm2388_vm0, %v2387_v0  ;;  %v2646_v6 = vld [vmem:[#allocation4 + $0x18] sm:$0xff]   ;;  %v2650_v7 = vld [vmem:[#allocation4 + $0x20] sm:$0xff]   ;;  %v2655_v8 = vld [vmem:[#allocation4 + $0x28] sm:$0xff]   ;;  %p366_p5 = scmp.lt.s32.totalorder %s2456_s9, 1  ;;  %s2390_s20 = smov 32   ;;  %vm1167_vm6 = vcmask 1043456  }
  0x82   : > { %1929 = vmatpush3.msra.mxu0 %v2629_v1  ;;  %1934 = vmatpush3.bf16.msra.mxu1 %v2632_v3  ;;  %v2659_v9 = vld [vmem:[#allocation4 + $0x30] sm:$0xff]   ;;  %v2664_v10 = vld [vmem:[#allocation4 + $0x38] sm:$0xff]   ;;  %v2185_v21 = vld [vmem:[#allocation4 + $0x40] sm:$0xff]   ;;  %s2391_s22 = smov 48  }
  0x83   : > { %1931 = vmatmul.mubr.msk.f32.vlgmr.msra.gmra.mrb[0].mxu0 %vm378_vm1, %v377_v2  ;;  %1953 = vmatprep.subr.mxu0 %v2387_v0  ;;  %v2681_v20 = vld [vmem:[%s2889_s4] sm:$0x3]  ;;  %v2186_v22 = vld [vmem:[#allocation4 + $0x48] sm:$0xff]   ;;  %v2188_v24 = vld [vmem:[#allocation4 + $0x58] sm:$0xff]   ;;  %s2913_s9 = smov (!%p366_p5, %s2456_s9), 1 }
  0x84   : > { %1955 = vmatprep.mubr.msk.f32.mxu0 %vm2388_vm0, %v2387_v0  ;;  %1935 = vmatprep.subr.bf16.mxu1 %v2387_v0  ;;  %v2187_v23 = vld [vmem:[#allocation4 + $0x50] sm:$0xff]   ;;  %v2189_v25 = vld [vmem:[#allocation4 + $0x60] sm:$0xff]   ;;  %v2190_v26 = vld [vmem:[#allocation4 + $0x68] sm:$0xff]   ;;  %s1806_s14 = sshll.u32 %s2913_s9, 3 }
  0x85   : > { %v2191_v27 = vld [vmem:[#allocation4 + $0x70] sm:$0xff]   ;;  %v2192_v28 = vld [vmem:[#allocation4 + $0x78] sm:$0xff]   ;;  %v2695_v29 = vld [vmem:[#allocation4 + $0x80] sm:$0xff]   ;;  %s369_s24 = scalar_lea.vmem %s2892_s7, %s1806_s14  ;;  %s373_s15 = scalar_lea.vmem %s2893_s8, %s1806_s14 }
  0x86   : > { %1936 = vmatpush3.bf16.msra.mxu1 %v2637_v4  ;;  %v2700_v30 = vld [vmem:[#allocation4 + $0x88] sm:$0xff]   ;;  %v2706_v31 = vld [vmem:[#allocation4 + $0x90] sm:$0xff]   ;;  %v2710_v32 = vld [vmem:[#allocation4 + $0x98] sm:$0xff]  }
  0x87   : > { %1937 = vmatprep.subr.bf16.mxu1 %v2387_v0  ;;  %v2714_v33 = vld [vmem:[#allocation4 + $0xa0] sm:$0xff]   ;;  %v2718_v34 = vld [vmem:[#allocation4 + $0xa8] sm:$0xff]   ;;  %v2722_v35 = vld [vmem:[#allocation4 + $0xb0] sm:$0xff]  }
  0x88   : > { %v2726_v36 = vld [vmem:[#allocation4 + $0xb8] sm:$0xff]   ;;  %v1829_v62 = vld [vmem:[%s2890_s5 + $0x1] ss:$0 sm:$0xff]  ;;  %v1818_v2 = vld [vmem:[%s2890_s5] ss:$0 sm:$0xff] }
  0x8a   : > { %1938 = vmatpush3.bf16.msra.mxu1 %v2643_v5 }
  0x8b   : > { %1939 = vmatprep.subr.bf16.mxu1 %v2387_v0 }
  0x8e   : > { %1940 = vmatpush3.bf16.msra.mxu1 %v2646_v6 }
  0x8f   : > { %1941 = vmatprep.subr.bf16.mxu1 %v2387_v0 }
  0x92   : > { %1942 = vmatpush3.bf16.msra.mxu1 %v2650_v7 }
  0x93   : > { %1943 = vmatprep.subr.bf16.mxu1 %v2387_v0 }
  0x96   : > { %1944 = vmatpush3.bf16.msra.mxu1 %v2655_v8 }
  0x97   : > { %1945 = vmatprep.subr.bf16.mxu1 %v2387_v0 }
  0x9a   : > { %1946 = vmatpush3.bf16.msra.mxu1 %v2659_v9 }
  0x9b   : > { %1947 = vmatprep.subr.bf16.mxu1 %v2387_v0 }
  0x9e   : > { %1948 = vmatpush3.bf16.msra.mxu1 %v2664_v10 }
  0x9f   : > { %1978 = vmatprep.subr.mxu1 %v2387_v0 }
 0x156   : > { %v2668_v11 = vpop.f32.mrb[0].mxu0 }
 0x157   : > { %v1932_v12 = vpop.f32.mrb[1].mxu0  ;;  %v2672_v13 = vpack.c.bf16 %v2668_v11, %v2668_v11 }
 0x158   : > { %v1330_v12 = vld [vmem:[#allocation7 + $0x8] sm:$0xff] }
 0x159   : > { %1950 = vmatmul.mubr.bf16.vlgmr.msra.gmra.mrb[0].mxu1 %v2672_v13 }
 0x15a   : > { %1980 = vmatprep.mubr.msk.f32.mxu1 %vm2388_vm0, %v2387_v0 }
 0x22c   : > { %v551_v14 = vpop.f32.mrb[0].mxu1 }
 0x22d   : > { %v557_v15 = vsub.f32 %v2668_v11, %v551_v14  ;;  %v1951_v16 = vpop.f32.mrb[1].mxu1 }
 0x22e   : > { %v554_v17 = vpop.f32.mrb[2].mxu1 }
 0x22f   : > { %v558_v18 = vmul.f32 %v557_v15, %v557_v15  ;;  %v1952_v19 = vpop.f32.mrb[3].mxu1 }
 0x231   : > { %1954 = vmatpush3.msra.mxu0 %v558_v18 }
 0x232   : > { %1956 = vmatmul.mubr.msk.f32.vlgmr.msra.gmra.mrb[2].mxu0 %vm378_vm1, %v2681_v20  ;;  %1958 = vmatprep.subr.bf16.mxu0 %v2387_v0 }
 0x233   : > { %1959 = vmatpush3.bf16.msra.mxu0 %v2185_v21  ;;  %1974 = vmatprep.mubr.msk.bf16.mxu0 %vm2388_vm0, %v2387_v0 }
 0x234   : > { %1960 = vmatprep.subr.bf16.mxu0 %v2387_v0 }
 0x237   : > { %1961 = vmatpush3.bf16.msra.mxu0 %v2186_v22 }
 0x238   : > { %1962 = vmatprep.subr.bf16.mxu0 %v2387_v0 }
 0x23b   : > { %1963 = vmatpush3.bf16.msra.mxu0 %v2187_v23 }
 0x23c   : > { %1964 = vmatprep.subr.bf16.mxu0 %v2387_v0 }
 0x23f   : > { %1965 = vmatpush3.bf16.msra.mxu0 %v2188_v24 }
 0x240   : > { %1966 = vmatprep.subr.bf16.mxu0 %v2387_v0 }
 0x243   : > { %1967 = vmatpush3.bf16.msra.mxu0 %v2189_v25 }
 0x244   : > { %1968 = vmatprep.subr.bf16.mxu0 %v2387_v0 }
 0x247   : > { %1969 = vmatpush3.bf16.msra.mxu0 %v2190_v26 }
 0x248   : > { %1970 = vmatprep.subr.bf16.mxu0 %v2387_v0 }
 0x24b   : > { %1971 = vmatpush3.bf16.msra.mxu0 %v2191_v27 }
 0x24c   : > { %1972 = vmatprep.subr.bf16.mxu0 %v2387_v0 }
 0x24f   : > { %1973 = vmatpush3.bf16.msra.mxu0 %v2192_v28 }
 0x250   : > { %1983 = vmatprep.subr.bf16.mxu0 %v2387_v0 }
 0x252   : > { %1975 = vmatmul.mubr.bf16.vlgmr.msra.gmra.mrb[4].mxu0 %v2672_v13 }
 0x253   : > { %1984 = vmatpush3.bf16.msra.mxu0 %v2695_v29  ;;  %1999 = vmatprep.mubr.msk.bf16.mxu0 %vm2388_vm0, %v2387_v0 }
 0x254   : > { %1985 = vmatprep.subr.bf16.mxu0 %v2387_v0 }
 0x257   : > { %1986 = vmatpush3.bf16.msra.mxu0 %v2700_v30 }
 0x258   : > { %1987 = vmatprep.subr.bf16.mxu0 %v2387_v0 }
 0x25b   : > { %1988 = vmatpush3.bf16.msra.mxu0 %v2706_v31 }
 0x25c   : > { %1989 = vmatprep.subr.bf16.mxu0 %v2387_v0 }
 0x25f   : > { %1990 = vmatpush3.bf16.msra.mxu0 %v2710_v32 }
 0x260   : > { %1991 = vmatprep.subr.bf16.mxu0 %v2387_v0 }
 0x263   : > { %1992 = vmatpush3.bf16.msra.mxu0 %v2714_v33 }
 0x264   : > { %1993 = vmatprep.subr.bf16.mxu0 %v2387_v0 }
 0x267   : > { %1994 = vmatpush3.bf16.msra.mxu0 %v2718_v34 }
 0x268   : > { %1995 = vmatprep.subr.bf16.mxu0 %v2387_v0 }
 0x26b   : > { %1996 = vmatpush3.bf16.msra.mxu0 %v2722_v35 }
 0x26c   : > { %1997 = vmatprep.subr.bf16.mxu0 %v2387_v0 }
 0x26f   : > { %1998 = vmatpush3.bf16.msra.mxu0 %v2726_v36 }
 0x270   : > { %2028 = vmatprep.subr.bf16.mxu0 %v2387_v0 }
 0x272   : > { %2000 = vmatmul.mubr.bf16.vlgmr.msra.gmra.mrb[8].mxu0 %v2672_v13  ;;  %v1492_v13 = vld [vmem:[#allocation7 + $0x10] sm:$0xff] }
 0x273   : > { %2029 = vmatpush3.bf16.msra.mxu0 %v2185_v21  ;;  %2044 = vmatprep.mubr.msk.bf16.mxu0 %vm2388_vm0, %v2387_v0 }
 0x274   : > { %2030 = vmatprep.subr.bf16.mxu0 %v2387_v0 }
 0x277   : > { %2031 = vmatpush3.bf16.msra.mxu0 %v2186_v22 }
 0x278   : > { %2032 = vmatprep.subr.bf16.mxu0 %v2387_v0 }
 0x27b   : > { %2033 = vmatpush3.bf16.msra.mxu0 %v2187_v23 }
 0x27c   : > { %2034 = vmatprep.subr.bf16.mxu0 %v2387_v0 }
 0x27f   : > { %2035 = vmatpush3.bf16.msra.mxu0 %v2188_v24 }
 0x280   : > { %2036 = vmatprep.subr.bf16.mxu0 %v2387_v0 }
 0x283   : > { %2037 = vmatpush3.bf16.msra.mxu0 %v2189_v25 }
 0x284   : > { %2038 = vmatprep.subr.bf16.mxu0 %v2387_v0 }
 0x287   : > { %2039 = vmatpush3.bf16.msra.mxu0 %v2190_v26 }
 0x288   : > { %2040 = vmatprep.subr.bf16.mxu0 %v2387_v0 }
 0x28b   : > { %2041 = vmatpush3.bf16.msra.mxu0 %v2191_v27 }
 0x28c   : > { %2042 = vmatprep.subr.bf16.mxu0 %v2387_v0 }
 0x28f   : > { %2043 = vmatpush3.bf16.msra.mxu0 %v2192_v28 }
 0x290   : > { %2068 = vmatprep.subr.mxu0 %v2387_v0 }
 0x305   : > { %v628_v37 = vpop.f32.mrb[2].mxu0 }
 0x306   : > { %v1957_v38 = vpop.f32.mrb[3].mxu0  ;;  %v632_v54 = vsub.f32 0.0, %v628_v37 }
 0x308   : > { %v633_v56 = vmul.f32 1.442695, %v632_v54 }
 0x325   : > { %v742_v39 = vpop.f32.mrb[4].mxu0 }
 0x326   : > { %v748_v40 = vsub.f32 %v2668_v11, %v742_v39  ;;  %v1976_v41 = vpop.f32.mrb[5].mxu0 }
 0x327   : > { %v745_v42 = vpop.f32.mrb[6].mxu0 }
 0x328   : > { %v749_v43 = vmul.f32 %v748_v40, %v748_v40  ;;  %v1977_v44 = vpop.f32.mrb[7].mxu0 }
 0x32a   : > { %1979 = vmatpush3.msra.mxu1 %v749_v43 }
 0x32b   : > { %1981 = vmatmul.mubr.msk.f32.vlgmr.msra.gmra.mrb[4].mxu1 %vm378_vm1, %v2681_v20  ;;  %2003 = vmatprep.subr.mxu1 %v2387_v0 }
 0x32c   : > { %2005 = vmatprep.mubr.msk.f32.mxu1 %vm2388_vm0, %v2387_v0 }
 0x345   : > { %v932_v45 = vpop.f32.mrb[8].mxu0 }
 0x346   : > { %v938_v46 = vsub.f32 %v2668_v11, %v932_v45  ;;  %v2001_v47 = vpop.f32.mrb[9].mxu0  ;;  %v1170_v11 = vld [vmem:[#allocation7] sm:$0xff] }
 0x347   : > { %v935_v48 = vpop.f32.mrb[10].mxu0 }
 0x348   : > { %v939_v49 = vmul.f32 %v938_v46, %v938_v46  ;;  %v2002_v50 = vpop.f32.mrb[11].mxu0 }
 0x34a   : > { %2004 = vmatpush3.msra.mxu1 %v939_v49 }
 0x34b   : > { %2006 = vmatmul.mubr.msk.f32.vlgmr.msra.gmra.mrb[6].mxu1 %vm378_vm1, %v2681_v20  ;;  %2008 = vmatprep.subr.bf16.mxu1 %v2387_v0 }
 0x34c   : > { %2009 = vmatpush3.bf16.msra.mxu1 %v2632_v3  ;;  %2024 = vmatprep.mubr.msk.bf16.mxu1 %vm2388_vm0, %v2387_v0 }
 0x34d   : > { %2010 = vmatprep.subr.bf16.mxu1 %v2387_v0 }
 0x350   : > { %2011 = vmatpush3.bf16.msra.mxu1 %v2637_v4  ;;  %v1840_v4 = vld [vmem:[%s2890_s5 + $0x2] ss:$0 sm:$0xff] }
 0x351   : > { %2012 = vmatprep.subr.bf16.mxu1 %v2387_v0 }
 0x354   : > { %2013 = vmatpush3.bf16.msra.mxu1 %v2643_v5 }
 0x355   : > { %2014 = vmatprep.subr.bf16.mxu1 %v2387_v0 }
 0x358   : > { %2015 = vmatpush3.bf16.msra.mxu1 %v2646_v6 }
 0x359   : > { %2016 = vmatprep.subr.bf16.mxu1 %v2387_v0 }
 0x35c   : > { %2017 = vmatpush3.bf16.msra.mxu1 %v2650_v7 }
 0x35d   : > { %2018 = vmatprep.subr.bf16.mxu1 %v2387_v0 }
 0x360   : > { %2019 = vmatpush3.bf16.msra.mxu1 %v2655_v8 }
 0x361   : > { %2020 = vmatprep.subr.bf16.mxu1 %v2387_v0 }
 0x364   : > { %2021 = vmatpush3.bf16.msra.mxu1 %v2659_v9 }
 0x365   : > { %2022 = vmatprep.subr.bf16.mxu1 %v2387_v0 }
 0x368   : > { %2023 = vmatpush3.bf16.msra.mxu1 %v2664_v10 }
 0x369   : > { %2048 = vmatprep.subr.bf16.mxu1 %v2387_v0 }
 0x3fe   : > { %v816_v51 = vpop.f32.mrb[4].mxu1 }
 0x3ff   : > { %v1982_v52 = vpop.f32.mrb[5].mxu1  ;;  %v820_v53 = vsub.f32 0.0, %v816_v51 }
 0x401   : > { %v821_v55 = vmul.f32 1.442695, %v820_v53 }
 0x403   : > { %2201 = vpow2.f32 %v821_v55 }
 0x404   : > { %2203 = vpow2.f32 %v633_v56 }
 0x40d   : > { %v2202_v61 = vpop.eup %2201 }
 0x40e   : > { %v2204_v63 = vpop.eup %2203  ;;  %v2776_v3 = vmul.f32 %v2202_v61, %v1829_v62 }
 0x40f   : > { %v2781_v5 = vmul.f32 %v2204_v63, %v1818_v2 }
 0x411   : > { %v832_v7 = vadd.f32 %v2776_v3, %v2781_v5 }
 0x41e   : > { %v1006_v57 = vpop.f32.mrb[6].mxu1 }
 0x41f   : > { %v1010_v58 = vsub.f32 0.0, %v1006_v57  ;;  %v2007_v59 = vpop.f32.mrb[7].mxu1 }
 0x421   : > { %v1011_v60 = vmul.f32 1.442695, %v1010_v58 }
 0x423   : > { %2205 = vpow2.f32 %v1011_v60 }
 0x42d   : > { %v2206_v6 = vpop.eup %2205 }
 0x42e   : > { %v2785_v8 = vmul.f32 %v2206_v6, %v1840_v4  ;;  %v1843_v6 = vld [vmem:[%s2891_s6] ss:$0 sm:$0xff] }
 0x430   : > { %v2788_v9 = vadd.f32 %v2785_v8, %v832_v7  ;;  %v1847_v7 = vld [vmem:[%s2891_s6 + $0x1] ss:$0 sm:$0xff] }
 0x432   : > { %v1023_v10 = vpack.c.bf16 %v2788_v9, %v2788_v9 }
 0x434   : > { %2025 = vmatmul.mubr.bf16.vlgmr.msra.gmra.mrb[8].mxu1 %v1023_v10  ;;  %2045 = vmatmul.mubr.bf16.vlgmr.msra.gmra.mrb[12].mxu0 %v1023_v10 }
 0x435   : > { %2049 = vmatpush3.bf16.msra.mxu1 %v2695_v29  ;;  %2069 = vmatpush3.msra.mxu0 %v2629_v1 }
 0x436   : > { %2050 = vmatprep.subr.bf16.mxu1 %v2387_v0  ;;  %2070 = vmatprep.mubr.msk.f32.mxu0 %vm2388_vm0, %v2387_v0 }
 0x437   : > { %2064 = vmatprep.mubr.msk.bf16.mxu1 %vm2388_vm0, %v2387_v0  ;;  %2073 = vmatprep.subr.mxu0 %v2387_v0 }
 0x439   : > { %2051 = vmatpush3.bf16.msra.mxu1 %v2700_v30 }
 0x43a   : > { %2052 = vmatprep.subr.bf16.mxu1 %v2387_v0 }
 0x43c   : > { %2071 = vmatmul.mubr.msk.f32.vlgmr.msra.gmra.mrb[16].mxu0 %vm378_vm1, %v1170_v11 }
 0x43d   : > { %2053 = vmatpush3.bf16.msra.mxu1 %v2706_v31  ;;  %2075 = vmatprep.mubr.msk.f32.mxu0 %vm2388_vm0, %v2387_v0 }
 0x43e   : > { %2054 = vmatprep.subr.bf16.mxu1 %v2387_v0 }
 0x441   : > { %2055 = vmatpush3.bf16.msra.mxu1 %v2710_v32 }
 0x442   : > { %2056 = vmatprep.subr.bf16.mxu1 %v2387_v0 }
 0x445   : > { %2057 = vmatpush3.bf16.msra.mxu1 %v2714_v33 }
 0x446   : > { %2058 = vmatprep.subr.bf16.mxu1 %v2387_v0 }
 0x449   : > { %2059 = vmatpush3.bf16.msra.mxu1 %v2718_v34 }
 0x44a   : > { %2060 = vmatprep.subr.bf16.mxu1 %v2387_v0 }
 0x44d   : > { %2061 = vmatpush3.bf16.msra.mxu1 %v2722_v35 }
 0x44e   : > { %2062 = vmatprep.subr.bf16.mxu1 %v2387_v0 }
 0x451   : > { %2063 = vmatpush3.bf16.msra.mxu1 %v2726_v36 }
 0x452   : > { %2078 = vmatprep.subr.mxu1 %v2387_v0 }
 0x454   : > { %2065 = vmatmul.mubr.bf16.vlgmr.msra.gmra.mrb[12].mxu1 %v1023_v10 }
 0x455   : > { %2079 = vmatpush3.msra.mxu1 %v2629_v1  ;;  %2080 = vmatprep.mubr.msk.f32.mxu1 %vm2388_vm0, %v2387_v0 }
 0x456   : > { %2088 = vmatprep.subr.mxu1 %v2387_v0 }
 0x45c   : > { %2081 = vmatmul.mubr.msk.f32.vlgmr.msra.gmra.mrb[16].mxu1 %vm378_vm1, %v1330_v12 }
 0x45d   : > { %2089 = vmatpush3.msra.mxu1 %v2629_v1  ;;  %2090 = vmatprep.mubr.msk.f32.mxu1 %vm2388_vm0, %v2387_v0 }
 0x460   : > { %2091 = vmatmul.mubr.msk.f32.vlgmr.msra.gmra.mrb[18].mxu1 %vm378_vm1, %v1492_v13 }
 0x507   : > { %v1058_v14 = vpop.f32.mrb[8].mxu1  ;;  %v1103_v15 = vpop.f32.mrb[12].mxu0 }
 0x508   : > { %v1064_v16 = vmul.f32 %v1058_v14, %v2788_v9  ;;  %v1109_v17 = vmul.f32 %v1103_v15, %v2788_v9  ;;  %v2026_v18 = vpop.f32.mrb[9].mxu1  ;;  %v2046_v19 = vpop.f32.mrb[13].mxu0 }
 0x509   : > { %v1061_v21 = vpop.f32.mrb[10].mxu1  ;;  %v1106_v22 = vpop.f32.mrb[14].mxu0 }
 0x50a   : > { %2207 = vrsqrt.f32 %v1064_v16  ;;  %v2027_v23 = vpop.f32.mrb[11].mxu1  ;;  %v2047_v24 = vpop.f32.mrb[15].mxu0  ;;  %vm1065_vm2 = vcmp.gt.f32.partialorder %v1064_v16, 0.0  ;;  %vm1110_vm3 = vcmp.gt.f32.partialorder %v1109_v17, 0.0 }
 0x50b   : > { %2209 = vrsqrt.f32 %v1109_v17 }
 0x50f   : > { %v1240_v1 = vpop.f32.mrb[16].mxu0 }
 0x510   : > { %1244 = vrot.lane.b32.xlu0 %v1240_v1, %s2389_s21  ;;  %v2072_v25 = vpop.f32.mrb[17].mxu0 }
 0x514   : > { %v2208_v26 = vpop.eup %2207 }
 0x515   : > { %v2210_v27 = vpop.eup %2209  ;;  %v1067_v28 = vsel %vm1065_vm2, %v2208_v26, 0.0 }
 0x516   : > { %v1112_v29 = vsel %vm1110_vm3, %v2210_v27, 0.0  ;;  %v1068_v31 = vmul.f32 %v1067_v28, %v2781_v5 }
 0x517   : > { %v1113_v30 = vmul.f32 %v1112_v29, %v2776_v3 }
 0x519   : > { %v1160_v32 = vrot.slane %v1113_v30, 6 }
 0x51b   : > { %v1166_v33 = vsel %vm1165_vm4, %v1068_v31, %v1160_v32 }
 0x527   : > { %v1148_v34 = vpop.f32.mrb[12].mxu1 }
 0x528   : > { %v1154_v35 = vmul.f32 %v1148_v34, %v2788_v9  ;;  %v2066_v36 = vpop.f32.mrb[13].mxu1 }
 0x529   : > { %v1151_v37 = vpop.f32.mrb[14].mxu1 }
 0x52a   : > { %2211 = vrsqrt.f32 %v1154_v35  ;;  %v2067_v38 = vpop.f32.mrb[15].mxu1  ;;  %vm1155_vm5 = vcmp.gt.f32.partialorder %v1154_v35, 0.0 }
 0x52f   : > { %v1400_v39 = vpop.f32.mrb[16].mxu1 }
 0x530   : > { %v2082_v40 = vpop.f32.mrb[17].mxu1  ;;  %1404 = vrot.lane.b32.xlu0 %v1400_v39, %s2390_s20 }
 0x533   : > { %v1562_v41 = vpop.f32.mrb[18].mxu1 }
 0x534   : > { %v2212_v42 = vpop.eup %2211  ;;  %1566 = vrot.lane.b32.xlu1 %v1562_v41, %s2391_s22  ;;  %v2092_v43 = vpop.f32.mrb[19].mxu1 }
 0x535   : > { %v1157_v44 = vsel %vm1155_vm5, %v2212_v42, 0.0 }
 0x536   : > { %v1158_v45 = vmul.f32 %v1157_v44, %v2785_v8 }
 0x538   : > { %v1163_v46 = vrot.slane %v1158_v45, 4 }
 0x53a   : > { %v1168_v47 = vsel %vm1167_vm6, %v1166_v33, %v1163_v46 }
 0x53b   : > { %1169 = vst [vmem:[%s369_s24] sm:$0x3f] %v1168_v47 }
 0x582   : > { %v1245_v48 = vpop.permute.xlu0 %1244 }
 0x583   : > { %v1246_v49 = vsub.f32 %v1245_v48, %v1240_v1 }
 0x585   : > { %v1247_v50 = vmul.f32 %v1246_v49, %v1246_v49 }
 0x587   : > { %v1248_v51 = vsub.f32 0.0, %v1247_v50 }
 0x589   : > { %v1249_v52 = vmul.f32 1.442695, %v1248_v51 }
 0x58b   : > { %2213 = vpow2.f32 %v1249_v52 }
 0x595   : > { %v2214_v53 = vpop.eup %2213 }
 0x596   : > { %2074 = vmatpush3.msra.mxu0 %v2214_v53 }
 0x597   : > { %2076 = vmatmul.mubr.msk.f32.vlgmr.msra.gmra.mrb[18].mxu0 %vm378_vm1, %v2681_v20  ;;  %2083 = vmatprep.subr.mxu0 %v2387_v0 }
 0x598   : > { %2085 = vmatprep.mubr.msk.f32.mxu0 %vm2388_vm0, %v2387_v0 }
 0x5a2   : > { %v1405_v54 = vpop.permute.xlu0 %1404 }
 0x5a3   : > { %v1406_v55 = vsub.f32 %v1405_v54, %v1400_v39 }
 0x5a5   : > { %v1407_v56 = vmul.f32 %v1406_v55, %v1406_v55 }
 0x5a6   : > { %v1567_v57 = vpop.permute.xlu1 %1566 }
 0x5a7   : > { %v1408_v58 = vsub.f32 0.0, %v1407_v56  ;;  %v1568_v59 = vsub.f32 %v1567_v57, %v1562_v41 }
 0x5a9   : > { %v1409_v60 = vmul.f32 1.442695, %v1408_v58  ;;  %v1569_v61 = vmul.f32 %v1568_v59, %v1568_v59 }
 0x5ab   : > { %2215 = vpow2.f32 %v1409_v60  ;;  %v1570_v62 = vsub.f32 0.0, %v1569_v61 }
 0x5ad   : > { %v1571_v63 = vmul.f32 1.442695, %v1570_v62 }
 0x5af   : > { %2217 = vpow2.f32 %v1571_v63 }
 0x5b5   : > { %v2216_v2 = vpop.eup %2215 }
 0x5b6   : > { %2084 = vmatpush3.msra.mxu0 %v2216_v2 }
 0x5b7   : > { %2086 = vmatmul.mubr.msk.f32.vlgmr.msra.gmra.mrb[20].mxu0 %vm378_vm1, %v2681_v20  ;;  %2093 = vmatprep.subr.mxu0 %v2387_v0 }
 0x5b8   : > { %2095 = vmatprep.mubr.msk.f32.mxu0 %vm2388_vm0, %v2387_v0  ;;  %v1851_v0 = vld [vmem:[%s2891_s6 + $0x2] ss:$0 sm:$0xff] }
 0x5b9   : > { %v2218_v3 = vpop.eup %2217 }
 0x5ba   : > { %2094 = vmatpush3.msra.mxu0 %v2218_v3 }
 0x5bb   : > { %2096 = vmatmul.mubr.msk.f32.vlgmr.msra.gmra.mrb[22].mxu0 %vm378_vm1, %v2681_v20 }
 0x66a   : > { %v1317_v4 = vpop.f32.mrb[18].mxu0 }
 0x66b   : > { %v2077_v5 = vpop.f32.mrb[19].mxu0  ;;  %v1328_v9 = vmul.f32 %v1843_v6, %v1317_v4 }
 0x68a   : > { %v1477_v8 = vpop.f32.mrb[20].mxu0 }
 0x68b   : > { %v1489_v10 = vmul.f32 %v1847_v7, %v1477_v8  ;;  %v2087_v11 = vpop.f32.mrb[21].mxu0 }
 0x68d   : > { %v1490_v20 = vadd.f32 %v1489_v10, %v1328_v9 }
 0x68e   : > { %v1639_v12 = vpop.f32.mrb[22].mxu0 }
 0x68f   : > { %v1651_v13 = vmul.f32 %v1851_v0, %v1639_v12  ;;  %v2097_v14 = vpop.f32.mrb[23].mxu0 }
 0x691   : > { %v1652_v15 = vadd.f32 %v1651_v13, %v1490_v20 }
 0x693   : > { %2219 = vrcp.f32 %v1652_v15  ;;  %vm1653_vm7 = vcmp.gt.f32.partialorder %v1652_v15, 0.0 }
 0x69d   : > { %v2220_v16 = vpop.eup %2219 }
 0x69e   : > { %v1655_v17 = vsel %vm1653_vm7, %v2220_v16, 0.0 }
 0x69f   : > { %v1656_v18 = vmul.f32 %v1655_v17, %v1328_v9  ;;  %v1657_v19 = vmul.f32 %v1655_v17, %v1489_v10  ;;  %v1658_v21 = vmul.f32 %v1655_v17, %v1651_v13 }
 0x6a1   : > { %v1660_v22 = vrot.slane %v1657_v19, 6  ;;  %v1663_v23 = vrot.slane %v1658_v21, 4 }
 0x6a3   : > { %v1665_v24 = vsel %vm1165_vm4, %v1656_v18, %v1660_v22 }
 0x6a4   : > { %v1666_v1 = vsel %vm1167_vm6, %v1665_v24, %v1663_v23 }
 0x6a5   : > { %1667 = vst [vmem:[%s373_s15] sm:$0x3f] %v1666_v1 }
 0x6a6 PF: > { %p21_p9 = scmp.ge.s32.totalorder %s2558_s12, 4   ;;  %s2908_s27 = smov %s2369_s28 }
 0x6a7   : > { %s2909_s28 = smov %s2373_s29  ;;  %s2910_s29 = smov %s2568_s19 }
 0x6a8   : > { %s2911_s30 = smov %s2558_s12  ;;  %23 = sbr.rel (!%p21_p9) target bundleno = 5 (0x5), region = 120 }
 0x6af   :  { %1701 = vsyncpa [#allocation3], 1 }
 0x6b0   :  { %1703 = vsyncpa [#allocation3 + $0x1], 1 }
 0x6b1   :  { %1704 = vsyncpa [#allocation5], 1 }
 0x6b2   :  { %1705 = vsyncpa [#allocation8], 1 }

</bundles_post_ra>
